<compile_context>
chip_gen: v6e
topology: v6e:2x2x1
jax: 0.10.0
libtpu: 0.0.40
codegen_flags: <defaults>
</compile_context>

<pallas_src>
import functools

import jax
import jax.numpy as jnp
import numpy as np
from jax.experimental import pallas as pl
from jax.experimental.pallas import tpu as pltpu

EPS = 1e-5

# 3x3 tap order: CENTER FIRST so the 1x1-shortcut operand is columns [0, Cin)
# of the conv1 im2col matrix (lane-aligned slice, no extra HBM read).
TAPS = ((1, 1), (0, 0), (0, 1), (0, 2), (1, 0), (1, 2), (2, 0), (2, 1), (2, 2))


def _round_up(x, m):
    return (x + m - 1) // m * m


def _vmem_limit(block_bytes):
    """Scoped-VMEM request: double-buffered blocks + headroom, capped for v7x."""
    need = 2 * int(sum(block_bytes)) + (4 << 20)
    return int(min(max(need, 32 << 20), 64 << 20))


# ---------------------------------------------------------------------------
# Pallas kernels
# ---------------------------------------------------------------------------
def _matmul_stats_kernel(a_ref, w_ref, y_ref, sum_ref, ssq_ref):
    """(TM,K)@(K,C): bf16 operands, f32 accumulate, + per-tile channel sum/sumsq."""
    y = jnp.dot(a_ref[...], w_ref[...], preferred_element_type=jnp.float32)
    y_ref[...] = y
    s = jnp.sum(y, axis=0, keepdims=True)        # (1, Cp) f32
    q = jnp.sum(y * y, axis=0, keepdims=True)    # (1, Cp) f32
    sum_ref[...] = jnp.broadcast_to(s, sum_ref.shape)
    ssq_ref[...] = jnp.broadcast_to(q, ssq_ref.shape)


def _matmul_stats_shortcut_kernel(a_ref, w_ref, ws_ref, y_ref, r_ref,
                                  sum_ref, ssq_ref, rsum_ref, rssq_ref):
    """conv1 matmul + stats, plus fused 1x1-projection-shortcut matmul + stats.

    The shortcut lhs is the center-tap column block of the SAME a tile
    (columns [0, Csl)); the padded ws rows beyond Cin are zero so extra
    columns contribute nothing.
    """
    a = a_ref[...]                                                  # (tm, Kp) bf16
    y = jnp.dot(a, w_ref[...], preferred_element_type=jnp.float32)  # (tm, Cp)
    y_ref[...] = y
    sum_ref[...] = jnp.broadcast_to(jnp.sum(y, axis=0, keepdims=True),
                                    sum_ref.shape)
    ssq_ref[...] = jnp.broadcast_to(jnp.sum(y * y, axis=0, keepdims=True),
                                    ssq_ref.shape)

    csl = ws_ref.shape[0]                                           # static
    r = jnp.dot(a[:, :csl], ws_ref[...], preferred_element_type=jnp.float32)
    r_ref[...] = r
    rsum_ref[...] = jnp.broadcast_to(jnp.sum(r, axis=0, keepdims=True),
                                     rsum_ref.shape)
    rssq_ref[...] = jnp.broadcast_to(jnp.sum(r * r, axis=0, keepdims=True),
                                     rssq_ref.shape)


def _affine_kernel(y_ref, sc_ref, sh_ref, o_ref, *, relu):
    """Tiled per-channel scale*y+shift (folded BatchNorm) + optional ReLU (f32)."""
    out = y_ref[...] * sc_ref[...] + sh_ref[...]
    if relu:
        out = jnp.maximum(out, 0.0)
    o_ref[...] = out.astype(o_ref.dtype)


def _affine_add_relu_kernel(y_ref, sc_ref, sh_ref, r_ref, o_ref):
    """BN2(y) + identity residual + ReLU, fused (identity-shortcut block)."""
    out = y_ref[...] * sc_ref[...] + sh_ref[...] + r_ref[...].astype(jnp.float32)
    o_ref[...] = jnp.maximum(out, 0.0)


def _dual_affine_add_relu_kernel(y_ref, sc_ref, sh_ref, r_ref, rsc_ref, rsh_ref,
                                 o_ref):
    """BN2(y) + BN_sc(projected residual) + add + ReLU, fused."""
    main = y_ref[...] * sc_ref[...] + sh_ref[...]
    res = r_ref[...].astype(jnp.float32) * rsc_ref[...] + rsh_ref[...]
    o_ref[...] = jnp.maximum(main + res, 0.0)


# ---------------------------------------------------------------------------
# pallas_call wrappers
# ---------------------------------------------------------------------------
def _reduce_stats(sums, ssqs, n, c, m_real):
    """Tiny (n_tiles, C) cross-tile reduction in plain JAX; divide by real M."""
    cp = sums.shape[-1]
    ch_sum = sums.reshape(n, 8, cp)[:, 0, :c].sum(axis=0)
    ch_ssq = ssqs.reshape(n, 8, cp)[:, 0, :c].sum(axis=0)
    mean = ch_sum / m_real
    var = ch_ssq / m_real - mean * mean      # biased variance (PyTorch train mode)
    return mean, var


def matmul_with_stats(a, w, *, tm):
    """y = a @ w (bf16 operands, f32 accumulate) plus per-channel mean / var."""
    M, K = a.shape
    C = w.shape[1]
    Mp, Kp, Cp = _round_up(M, tm), _round_up(K, 128), _round_up(C, 128)
    a_p = jnp.pad(a.astype(jnp.bfloat16), ((0, Mp - M), (0, Kp - K)))
    w_p = jnp.pad(w.astype(jnp.bfloat16), ((0, Kp - K), (0, Cp - C)))
    n = Mp // tm

    y_p, sums, ssqs = pl.pallas_call(
        _matmul_stats_kernel,
        grid=(n,),
        in_specs=[pl.BlockSpec((tm, Kp), lambda i: (i, 0)),
                  pl.BlockSpec((Kp, Cp), lambda i: (0, 0))],
        out_specs=(pl.BlockSpec((tm, Cp), lambda i: (i, 0)),
                   pl.BlockSpec((8, Cp), lambda i: (i, 0)),
                   pl.BlockSpec((8, Cp), lambda i: (i, 0))),
        out_shape=(jax.ShapeDtypeStruct((Mp, Cp), jnp.float32),
                   jax.ShapeDtypeStruct((n * 8, Cp), jnp.float32),
                   jax.ShapeDtypeStruct((n * 8, Cp), jnp.float32)),
        compiler_params=pltpu.CompilerParams(
            dimension_semantics=("parallel",),
            vmem_limit_bytes=_vmem_limit(
                [tm * Kp * 2, Kp * Cp * 2, tm * Cp * 4, 2 * 8 * Cp * 4])),
    )(a_p, w_p)

    mean, var = _reduce_stats(sums, ssqs, n, C, M)
    return y_p, mean, var


def matmul_with_stats_and_shortcut(a, w, ws, *, tm):
    """Fused conv1 + 1x1-projection-shortcut pass.

    Returns (y_padded, mean1, var1, res_padded, mean_sc, var_sc).
    """
    M, K = a.shape
    C = w.shape[1]
    Cin = ws.shape[0]
    Mp, Kp, Cp = _round_up(M, tm), _round_up(K, 128), _round_up(C, 128)
    Csl = _round_up(Cin, 128)                       # lane-aligned lhs slice width
    a_p = jnp.pad(a.astype(jnp.bfloat16), ((0, Mp - M), (0, Kp - K)))
    w_p = jnp.pad(w.astype(jnp.bfloat16), ((0, Kp - K), (0, Cp - C)))
    ws_p = jnp.pad(ws.astype(jnp.bfloat16), ((0, Csl - Cin), (0, Cp - C)))
    n = Mp // tm

    y_p, r_p, sums, ssqs, rsums, rssqs = pl.pallas_call(
        _matmul_stats_shortcut_kernel,
        grid=(n,),
        in_specs=[pl.BlockSpec((tm, Kp), lambda i: (i, 0)),
                  pl.BlockSpec((Kp, Cp), lambda i: (0, 0)),
                  pl.BlockSpec((Csl, Cp), lambda i: (0, 0))],
        out_specs=(pl.BlockSpec((tm, Cp), lambda i: (i, 0)),
                   pl.BlockSpec((tm, Cp), lambda i: (i, 0)),
                   pl.BlockSpec((8, Cp), lambda i: (i, 0)),
                   pl.BlockSpec((8, Cp), lambda i: (i, 0)),
                   pl.BlockSpec((8, Cp), lambda i: (i, 0)),
                   pl.BlockSpec((8, Cp), lambda i: (i, 0))),
        out_shape=(jax.ShapeDtypeStruct((Mp, Cp), jnp.float32),
                   jax.ShapeDtypeStruct((Mp, Cp), jnp.float32),
                   jax.ShapeDtypeStruct((n * 8, Cp), jnp.float32),
                   jax.ShapeDtypeStruct((n * 8, Cp), jnp.float32),
                   jax.ShapeDtypeStruct((n * 8, Cp), jnp.float32),
                   jax.ShapeDtypeStruct((n * 8, Cp), jnp.float32)),
        compiler_params=pltpu.CompilerParams(
            dimension_semantics=("parallel",),
            vmem_limit_bytes=_vmem_limit(
                [tm * Kp * 2, Kp * Cp * 2, Csl * Cp * 2,
                 2 * tm * Cp * 4, 4 * 8 * Cp * 4])),
    )(a_p, w_p, ws_p)

    mean, var = _reduce_stats(sums, ssqs, n, C, M)
    rmean, rvar = _reduce_stats(rsums, rssqs, n, C, M)
    return y_p, mean, var, r_p, rmean, rvar


def _pad_channel_vec(v, cp):
    return jnp.pad(v.astype(jnp.float32).reshape(1, -1), ((0, 0), (0, cp - v.shape[0])))


def apply_affine(y_p, scale, shift, *, relu, out_dtype, tm):
    Mp, Cp = y_p.shape
    n = Mp // tm
    sc = _pad_channel_vec(scale, Cp)
    sh = _pad_channel_vec(shift, Cp)
    out_bytes = jnp.dtype(out_dtype).itemsize
    return pl.pallas_call(
        functools.partial(_affine_kernel, relu=relu),
        grid=(n,),
        in_specs=[pl.BlockSpec((tm, Cp), lambda i: (i, 0)),
                  pl.BlockSpec((1, Cp), lambda i: (0, 0)),
                  pl.BlockSpec((1, Cp), lambda i: (0, 0))],
        out_specs=pl.BlockSpec((tm, Cp), lambda i: (i, 0)),
        out_shape=jax.ShapeDtypeStruct((Mp, Cp), out_dtype),
        compiler_params=pltpu.CompilerParams(
            dimension_semantics=("parallel",),
            vmem_limit_bytes=_vmem_limit(
                [tm * Cp * 4, 2 * Cp * 4, tm * Cp * out_bytes])),
    )(y_p, sc, sh)


def apply_affine_add_relu(y_p, scale, shift, res_p, *, tm):
    """Identity-shortcut epilogue: BN2(y) + res + ReLU."""
    Mp, Cp = y_p.shape
    n = Mp // tm
    sc = _pad_channel_vec(scale, Cp)
    sh = _pad_channel_vec(shift, Cp)
    rbytes = jnp.dtype(res_p.dtype).itemsize
    return pl.pallas_call(
        _affine_add_relu_kernel,
        grid=(n,),
        in_specs=[pl.BlockSpec((tm, Cp), lambda i: (i, 0)),
                  pl.BlockSpec((1, Cp), lambda i: (0, 0)),
                  pl.BlockSpec((1, Cp), lambda i: (0, 0)),
                  pl.BlockSpec((tm, Cp), lambda i: (i, 0))],
        out_specs=pl.BlockSpec((tm, Cp), lambda i: (i, 0)),
        out_shape=jax.ShapeDtypeStruct((Mp, Cp), jnp.float32),
        compiler_params=pltpu.CompilerParams(
            dimension_semantics=("parallel",),
            vmem_limit_bytes=_vmem_limit(
                [tm * Cp * 4, 2 * Cp * 4, tm * Cp * rbytes, tm * Cp * 4])),
    )(y_p, sc, sh, res_p)


def apply_dual_affine_add_relu(y_p, scale, shift, res_p, res_scale, res_shift, *, tm):
    """Projection-shortcut epilogue: BN2(y) + BN_sc(res) + ReLU."""
    Mp, Cp = y_p.shape
    n = Mp // tm
    sc = _pad_channel_vec(scale, Cp)
    sh = _pad_channel_vec(shift, Cp)
    rsc = _pad_channel_vec(res_scale, Cp)
    rsh = _pad_channel_vec(res_shift, Cp)
    rbytes = jnp.dtype(res_p.dtype).itemsize
    return pl.pallas_call(
        _dual_affine_add_relu_kernel,
        grid=(n,),
        in_specs=[pl.BlockSpec((tm, Cp), lambda i: (i, 0)),
                  pl.BlockSpec((1, Cp), lambda i: (0, 0)),
                  pl.BlockSpec((1, Cp), lambda i: (0, 0)),
                  pl.BlockSpec((tm, Cp), lambda i: (i, 0)),
                  pl.BlockSpec((1, Cp), lambda i: (0, 0)),
                  pl.BlockSpec((1, Cp), lambda i: (0, 0))],
        out_specs=pl.BlockSpec((tm, Cp), lambda i: (i, 0)),
        out_shape=jax.ShapeDtypeStruct((Mp, Cp), jnp.float32),
        compiler_params=pltpu.CompilerParams(
            dimension_semantics=("parallel",),
            vmem_limit_bytes=_vmem_limit(
                [tm * Cp * 4, tm * Cp * rbytes, 4 * Cp * 4, tm * Cp * 4])),
    )(y_p, sc, sh, res_p, rsc, rsh)


# ---------------------------------------------------------------------------
# Glue: im2col, weight repacking, BasicBlock orchestration
# ---------------------------------------------------------------------------
def im2col3x3(x_nhwc, stride):
    """3x3 / pad=1 im2col (center-tap-first ordering). -> ((N*Ho*Wo, 9*C), dims)."""
    N, H, W, C = x_nhwc.shape
    Ho = (H + 2 - 3) // stride + 1
    Wo = (W + 2 - 3) // stride + 1
    xp = jnp.pad(x_nhwc, ((0, 0), (1, 1), (1, 1), (0, 0)))
    cols = [xp[:,
               dy:dy + stride * (Ho - 1) + 1:stride,
               dx:dx + stride * (Wo - 1) + 1:stride,
               :] for (dy, dx) in TAPS]
    patches = jnp.concatenate(cols, axis=-1)               # (N, Ho, Wo, 9C)
    return patches.reshape(N * Ho * Wo, 9 * C), (N, Ho, Wo)


def repack_conv3x3_weight(w_oihw):
    """(Cout, Cin, 3, 3) -> (9*Cin, Cout), TAPS order, channel-minor per tap."""
    w = jnp.transpose(w_oihw, (2, 3, 1, 0))                # (3, 3, Cin, Cout)
    return jnp.concatenate([w[dy, dx] for (dy, dx) in TAPS], axis=0)


def repack_conv1x1_weight(w_oihw):
    """(Cout, Cin, 1, 1) -> (Cin, Cout)."""
    return jnp.transpose(w_oihw, (2, 3, 1, 0)).reshape(w_oihw.shape[1],
                                                       w_oihw.shape[0])


def _bn_scale_shift(mean, var, gamma, beta):
    """Fold train-mode BN (batch stats, biased var) into per-channel scale/shift."""
    scale = gamma.astype(jnp.float32) * jax.lax.rsqrt(var + EPS)
    shift = beta.astype(jnp.float32) - mean * scale
    return scale, shift


def basic_block_forward(x_nchw, params, in_planes, planes, stride, *, tm=256):
    assert tm % 8 == 0
    x = jnp.transpose(x_nchw, (0, 2, 3, 1)).astype(jnp.float32)   # NCHW -> NHWC
    has_proj = (stride != 1 or in_planes != planes)

    # conv1 (+ fused 1x1 projection shortcut) -> batch stats
    a1, (N, Ho, Wo) = im2col3x3(x.astype(jnp.bfloat16), stride)
    M = N * Ho * Wo
    w1 = repack_conv3x3_weight(params["conv1"])
    if has_proj:
        y1, mean1, var1, res, mean_sc, var_sc = matmul_with_stats_and_shortcut(
            a1, w1, repack_conv1x1_weight(params["conv_sc"]), tm=tm)
        rsc, rsh = _bn_scale_shift(mean_sc, var_sc,
                                   params["bnsc_g"], params["bnsc_b"])
    else:
        y1, mean1, var1 = matmul_with_stats(a1, w1, tm=tm)
        Mp, Cp = y1.shape
        res = jnp.pad(x.reshape(M, in_planes),
                      ((0, Mp - M), (0, Cp - in_planes)))          # identity, f32

    # bn1 + relu (folded affine), emit bf16 for the conv2 im2col re-read
    sc1, sh1 = _bn_scale_shift(mean1, var1, params["bn1_g"], params["bn1_b"])
    h1 = apply_affine(y1, sc1, sh1, relu=True, out_dtype=jnp.bfloat16, tm=tm)
    h1_img = h1[:M, :planes].reshape(N, Ho, Wo, planes)

    # conv2 -> bn2 -> (+ BN'd / identity shortcut) -> relu (one fused epilogue)
    a2, _ = im2col3x3(h1_img, 1)                                   # bf16 im2col
    y2, mean2, var2 = matmul_with_stats(a2, repack_conv3x3_weight(params["conv2"]),
                                        tm=tm)
    sc2, sh2 = _bn_scale_shift(mean2, var2, params["bn2_g"], params["bn2_b"])
    if has_proj:
        out = apply_dual_affine_add_relu(y2, sc2, sh2, res, rsc, rsh, tm=tm)
    else:
        out = apply_affine_add_relu(y2, sc2, sh2, res, tm=tm)

    out = out[:M, :planes].reshape(N, Ho, Wo, planes)
    return jnp.transpose(out, (0, 3, 1, 2))                        # back to NCHW


# ---------------------------------------------------------------------------
# Plain-JAX reference (same bf16-operand / f32-accumulate matmul policy as the
# kernels; BatchNorm with train-mode batch stats, biased variance, eps=1e-5 and
# ReLU in f32 — i.e. the PyTorch BasicBlock forward under mixed precision).
# ---------------------------------------------------------------------------
def ref_forward(x_nchw, params, in_planes, planes, stride):
    x = jnp.transpose(x_nchw, (0, 2, 3, 1)).astype(jnp.float32)

    def conv(xin, w, s, pad):
        return jax.lax.conv_general_dilated(
            xin.astype(jnp.bfloat16), w.astype(jnp.bfloat16), (s, s), pad,
            dimension_numbers=("NHWC", "OIHW", "NHWC"),
            preferred_element_type=jnp.float32)

    def bn(y, g, b):
        mean = jnp.mean(y, axis=(0, 1, 2), keepdims=True)
        var = jnp.mean(jnp.square(y - mean), axis=(0, 1, 2), keepdims=True)
        return (y - mean) * jax.lax.rsqrt(var + EPS) * g.reshape(1, 1, 1, -1) \
               + b.reshape(1, 1, 1, -1)

    out = jax.nn.relu(bn(conv(x, params["conv1"], stride, ((1, 1), (1, 1))),
                         params["bn1_g"], params["bn1_b"]))
    out = bn(conv(out, params["conv2"], 1, ((1, 1), (1, 1))),
             params["bn2_g"], params["bn2_b"])
    if stride != 1 or in_planes != planes:
        sc = bn(conv(x, params["conv_sc"], stride, "VALID"),
                params["bnsc_g"], params["bnsc_b"])
    else:
        sc = x
    out = jax.nn.relu(out + sc)
    return jnp.transpose(out, (0, 3, 1, 2))


# ---------------------------------------------------------------------------
# Deterministic parameter init (shapes per nn.Module __init__)
# ---------------------------------------------------------------------------
def init_params(key, in_planes, planes, stride):
    ks = jax.random.split(key, 3)

    def conv_init(k, cout, cin, kh, kw):
        fan_in = cin * kh * kw
        bound = 1.0 / np.sqrt(fan_in)
        return jax.random.uniform(k, (cout, cin, kh, kw), jnp.float32,
                                  -bound, bound)

    p = {
        "conv1": conv_init(ks[0], planes, in_planes, 3, 3),
        "bn1_g": jnp.ones((planes,), jnp.float32),
        "bn1_b": jnp.zeros((planes,), jnp.float32),
        "conv2": conv_init(ks[1], planes, planes, 3, 3),
        "bn2_g": jnp.ones((planes,), jnp.float32),
        "bn2_b": jnp.zeros((planes,), jnp.float32),
    }
    if stride != 1 or in_planes != planes:
        p["conv_sc"] = conv_init(ks[2], planes, in_planes, 1, 1)
        p["bnsc_g"] = jnp.ones((planes,), jnp.float32)
        p["bnsc_b"] = jnp.zeros((planes,), jnp.float32)
    return p


def _run_case(name, n, in_planes, planes, h, w, stride, tm, key):
    kx, kp = jax.random.split(key)
    x = jax.random.normal(kx, (n, in_planes, h, w), jnp.float32)  # NCHW
    params = init_params(kp, in_planes, planes, stride)

    fwd = jax.jit(functools.partial(basic_block_forward, in_planes=in_planes,
                                    planes=planes, stride=stride, tm=tm))
    out = jax.block_until_ready(fwd(x, params))
    ref = jax.block_until_ready(ref_forward(x, params, in_planes, planes, stride))
    np.testing.assert_allclose(np.asarray(out), np.asarray(ref),
                               rtol=5e-3, atol=5e-3, err_msg=name)


if __name__ == "__main__":
    key = jax.random.PRNGKey(0)
    k1, k2 = jax.random.split(key)
    # Small tm=64 so the grids have >1 tile and the cross-tile BN-stat
    # accumulation path is actually exercised.
    # 1) downsampling block: stride=2, channel change -> fused 1x1-conv shortcut.
    _run_case("conv_shortcut", 2, 4, 8, 16, 16, 2, 64, k1)
    # 2) identity-shortcut block: stride=1, in_planes == planes.
    _run_case("identity_shortcut", 2, 8, 8, 16, 16, 1, 64, k2)
    print("KERNEL_OK")
</pallas_src>

<mosaic_0001>
module attributes {stable_mosaic.version = 11 : i64} {
  func.func @_matmul_stats_shortcut_kernel(%arg0: i32, %arg1: memref<64x128xbf16, #tpu.memory_space<vmem>>, %arg2: memref<128x128xbf16, #tpu.memory_space<vmem>>, %arg3: memref<128x128xbf16, #tpu.memory_space<vmem>>, %arg4: memref<64x128xf32, #tpu.memory_space<vmem>>, %arg5: memref<64x128xf32, #tpu.memory_space<vmem>>, %arg6: memref<8x128xf32, #tpu.memory_space<vmem>>, %arg7: memref<8x128xf32, #tpu.memory_space<vmem>>, %arg8: memref<8x128xf32, #tpu.memory_space<vmem>>, %arg9: memref<8x128xf32, #tpu.memory_space<vmem>>) attributes {dimension_semantics = [#tpu.dimension_semantics<parallel>], iteration_bounds = array<i64: 2>, scalar_prefetch = 0 : i64, scratch_operands = 0 : i64, tpu.core_type = #tpu.core_type<tc>, window_params = [{transform_indices = @transform_0, window_bounds = array<i64: 64, 128>}, {pipeline_mode = #tpu.pipeline_mode<synchronous>, transform_indices = @transform_1, window_bounds = array<i64: 128, 128>}, {pipeline_mode = #tpu.pipeline_mode<synchronous>, transform_indices = @transform_2, window_bounds = array<i64: 128, 128>}, {transform_indices = @transform_3, window_bounds = array<i64: 64, 128>}, {transform_indices = @transform_4, window_bounds = array<i64: 64, 128>}, {transform_indices = @transform_5, window_bounds = array<i64: 8, 128>}, {transform_indices = @transform_6, window_bounds = array<i64: 8, 128>}, {transform_indices = @transform_7, window_bounds = array<i64: 8, 128>}, {transform_indices = @transform_8, window_bounds = array<i64: 8, 128>}]} {
    %c0 = arith.constant 0 : index
    %c0_0 = arith.constant 0 : index
    %0 = vector.load %arg1[%c0, %c0_0] : memref<64x128xbf16, #tpu.memory_space<vmem>>, vector<64x128xbf16>
    %c0_1 = arith.constant 0 : index
    %c0_2 = arith.constant 0 : index
    %1 = vector.load %arg2[%c0_1, %c0_2] : memref<128x128xbf16, #tpu.memory_space<vmem>>, vector<128x128xbf16>
    %cst = arith.constant dense<0.000000e+00> : vector<64x128xf32>
    %2 = tpu.matmul %0, %1, %cst {dimension_numbers = #tpu.dot_dimension_numbers<[1], [0], [0], [1], [0, 0, 1, 1], [], []>} : vector<64x128xbf16>, vector<128x128xbf16>, vector<64x128xf32> -> vector<64x128xf32>
    %c0_3 = arith.constant 0 : index
    %c0_4 = arith.constant 0 : index
    %3 = vector.load %arg4[%c0_3, %c0_4] : memref<64x128xf32, #tpu.memory_space<vmem>>, vector<64x128xf32>
    tpu.vector_store %arg4[%c0_3, %c0_4], %2 {strides = array<i32>} : memref<64x128xf32, #tpu.memory_space<vmem>>, vector<64x128xf32>,
    %cst_5 = arith.constant dense<0.000000e+00> : vector<128xf32>
    %4 = vector.multi_reduction <add>, %2, %cst_5 [0] : vector<64x128xf32> to vector<128xf32>
    %5 = vector.shape_cast %4 : vector<128xf32> to vector<1x128xf32>
    %6 = vector.shape_cast %5 : vector<1x128xf32> to vector<1x128xf32>
    %7 = vector.broadcast %6 : vector<1x128xf32> to vector<8x128xf32>
    %c0_6 = arith.constant 0 : index
    %c0_7 = arith.constant 0 : index
    %8 = vector.load %arg6[%c0_6, %c0_7] : memref<8x128xf32, #tpu.memory_space<vmem>>, vector<8x128xf32>
    tpu.vector_store %arg6[%c0_6, %c0_7], %7 {strides = array<i32>} : memref<8x128xf32, #tpu.memory_space<vmem>>, vector<8x128xf32>,
    %9 = arith.mulf %2, %2 : vector<64x128xf32>
    %cst_8 = arith.constant dense<0.000000e+00> : vector<128xf32>
    %10 = vector.multi_reduction <add>, %9, %cst_8 [0] : vector<64x128xf32> to vector<128xf32>
    %11 = vector.shape_cast %10 : vector<128xf32> to vector<1x128xf32>
    %12 = vector.shape_cast %11 : vector<1x128xf32> to vector<1x128xf32>
    %13 = vector.broadcast %12 : vector<1x128xf32> to vector<8x128xf32>
    %c0_9 = arith.constant 0 : index
    %c0_10 = arith.constant 0 : index
    %14 = vector.load %arg7[%c0_9, %c0_10] : memref<8x128xf32, #tpu.memory_space<vmem>>, vector<8x128xf32>
    tpu.vector_store %arg7[%c0_9, %c0_10], %13 {strides = array<i32>} : memref<8x128xf32, #tpu.memory_space<vmem>>, vector<8x128xf32>,
    %c0_11 = arith.constant 0 : index
    %c0_12 = arith.constant 0 : index
    %15 = vector.load %arg3[%c0_11, %c0_12] : memref<128x128xbf16, #tpu.memory_space<vmem>>, vector<128x128xbf16>
    %cst_13 = arith.constant dense<0.000000e+00> : vector<64x128xf32>
    %16 = tpu.matmul %0, %15, %cst_13 {dimension_numbers = #tpu.dot_dimension_numbers<[1], [0], [0], [1], [0, 0, 1, 1], [], []>} : vector<64x128xbf16>, vector<128x128xbf16>, vector<64x128xf32> -> vector<64x128xf32>
    %c0_14 = arith.constant 0 : index
    %c0_15 = arith.constant 0 : index
    %17 = vector.load %arg5[%c0_14, %c0_15] : memref<64x128xf32, #tpu.memory_space<vmem>>, vector<64x128xf32>
    tpu.vector_store %arg5[%c0_14, %c0_15], %16 {strides = array<i32>} : memref<64x128xf32, #tpu.memory_space<vmem>>, vector<64x128xf32>,
    %cst_16 = arith.constant dense<0.000000e+00> : vector<128xf32>
    %18 = vector.multi_reduction <add>, %16, %cst_16 [0] : vector<64x128xf32> to vector<128xf32>
    %19 = vector.shape_cast %18 : vector<128xf32> to vector<1x128xf32>
    %20 = vector.shape_cast %19 : vector<1x128xf32> to vector<1x128xf32>
    %21 = vector.broadcast %20 : vector<1x128xf32> to vector<8x128xf32>
    %c0_17 = arith.constant 0 : index
    %c0_18 = arith.constant 0 : index
    %22 = vector.load %arg8[%c0_17, %c0_18] : memref<8x128xf32, #tpu.memory_space<vmem>>, vector<8x128xf32>
    tpu.vector_store %arg8[%c0_17, %c0_18], %21 {strides = array<i32>} : memref<8x128xf32, #tpu.memory_space<vmem>>, vector<8x128xf32>,
    %23 = arith.mulf %16, %16 : vector<64x128xf32>
    %cst_19 = arith.constant dense<0.000000e+00> : vector<128xf32>
    %24 = vector.multi_reduction <add>, %23, %cst_19 [0] : vector<64x128xf32> to vector<128xf32>
    %25 = vector.shape_cast %24 : vector<128xf32> to vector<1x128xf32>
    %26 = vector.shape_cast %25 : vector<1x128xf32> to vector<1x128xf32>
    %27 = vector.broadcast %26 : vector<1x128xf32> to vector<8x128xf32>
    %c0_20 = arith.constant 0 : index
    %c0_21 = arith.constant 0 : index
    %28 = vector.load %arg9[%c0_20, %c0_21] : memref<8x128xf32, #tpu.memory_space<vmem>>, vector<8x128xf32>
    tpu.vector_store %arg9[%c0_20, %c0_21], %27 {strides = array<i32>} : memref<8x128xf32, #tpu.memory_space<vmem>>, vector<8x128xf32>,
    return
  }
  func.func @transform_0(%arg0: i32) -> (i32, i32) {
    %c0_i32 = arith.constant 0 : i32
    %c0_i32_0 = arith.constant 0 : i32
    return %arg0, %c0_i32 : i32, i32
  }
  func.func @transform_1(%arg0: i32) -> (i32, i32) {
    %c0_i32 = arith.constant 0 : i32
    %c0_i32_0 = arith.constant 0 : i32
    %c0_i32_1 = arith.constant 0 : i32
    return %c0_i32, %c0_i32_0 : i32, i32
  }
  func.func @transform_2(%arg0: i32) -> (i32, i32) {
    %c0_i32 = arith.constant 0 : i32
    %c0_i32_0 = arith.constant 0 : i32
    %c0_i32_1 = arith.constant 0 : i32
    return %c0_i32, %c0_i32_0 : i32, i32
  }
  func.func @transform_3(%arg0: i32) -> (i32, i32) {
    %c0_i32 = arith.constant 0 : i32
    %c0_i32_0 = arith.constant 0 : i32
    return %arg0, %c0_i32 : i32, i32
  }
  func.func @transform_4(%arg0: i32) -> (i32, i32) {
    %c0_i32 = arith.constant 0 : i32
    %c0_i32_0 = arith.constant 0 : i32
    return %arg0, %c0_i32 : i32, i32
  }
  func.func @transform_5(%arg0: i32) -> (i32, i32) {
    %c0_i32 = arith.constant 0 : i32
    %c0_i32_0 = arith.constant 0 : i32
    return %arg0, %c0_i32 : i32, i32
  }
  func.func @transform_6(%arg0: i32) -> (i32, i32) {
    %c0_i32 = arith.constant 0 : i32
    %c0_i32_0 = arith.constant 0 : i32
    return %arg0, %c0_i32 : i32, i32
  }
  func.func @transform_7(%arg0: i32) -> (i32, i32) {
    %c0_i32 = arith.constant 0 : i32
    %c0_i32_0 = arith.constant 0 : i32
    return %arg0, %c0_i32 : i32, i32
  }
  func.func @transform_8(%arg0: i32) -> (i32, i32) {
    %c0_i32 = arith.constant 0 : i32
    %c0_i32_0 = arith.constant 0 : i32
    return %arg0, %c0_i32 : i32, i32
  }
}

module attributes {stable_mosaic.version = 11 : i64} {
  func.func @_affine_kernel(%arg0: i32, %arg1: memref<64x128xf32, #tpu.memory_space<vmem>>, %arg2: memref<1x128xf32, #tpu.memory_space<vmem>>, %arg3: memref<1x128xf32, #tpu.memory_space<vmem>>, %arg4: memref<64x128xbf16, #tpu.memory_space<vmem>>) attributes {dimension_semantics = [#tpu.dimension_semantics<parallel>], iteration_bounds = array<i64: 2>, scalar_prefetch = 0 : i64, scratch_operands = 0 : i64, tpu.core_type = #tpu.core_type<tc>, window_params = [{transform_indices = @transform_0, window_bounds = array<i64: 64, 128>}, {pipeline_mode = #tpu.pipeline_mode<synchronous>, transform_indices = @transform_1, window_bounds = array<i64: 1, 128>}, {pipeline_mode = #tpu.pipeline_mode<synchronous>, transform_indices = @transform_2, window_bounds = array<i64: 1, 128>}, {transform_indices = @transform_3, window_bounds = array<i64: 64, 128>}]} {
    %c0 = arith.constant 0 : index
    %c0_0 = arith.constant 0 : index
    %0 = vector.load %arg1[%c0, %c0_0] : memref<64x128xf32, #tpu.memory_space<vmem>>, vector<64x128xf32>
    %c0_1 = arith.constant 0 : index
    %c0_2 = arith.constant 0 : index
    %1 = vector.load %arg2[%c0_1, %c0_2] : memref<1x128xf32, #tpu.memory_space<vmem>>, vector<1x128xf32>
    %2 = vector.broadcast %1 : vector<1x128xf32> to vector<64x128xf32>
    %3 = arith.mulf %0, %2 : vector<64x128xf32>
    %c0_3 = arith.constant 0 : index
    %c0_4 = arith.constant 0 : index
    %4 = vector.load %arg3[%c0_3, %c0_4] : memref<1x128xf32, #tpu.memory_space<vmem>>, vector<1x128xf32>
    %5 = vector.broadcast %4 : vector<1x128xf32> to vector<64x128xf32>
    %6 = arith.addf %3, %5 : vector<64x128xf32>
    %cst = arith.constant 0.000000e+00 : f32
    %7 = vector.broadcast %cst : f32 to vector<64x128xf32>
    %8 = arith.maximumf %6, %7 : vector<64x128xf32>
    %9 = arith.truncf %8 : vector<64x128xf32> to vector<64x128xbf16>
    %c0_5 = arith.constant 0 : index
    %c0_6 = arith.constant 0 : index
    %10 = vector.load %arg4[%c0_5, %c0_6] : memref<64x128xbf16, #tpu.memory_space<vmem>>, vector<64x128xbf16>
    tpu.vector_store %arg4[%c0_5, %c0_6], %9 {strides = array<i32>} : memref<64x128xbf16, #tpu.memory_space<vmem>>, vector<64x128xbf16>,
    return
  }
  func.func @transform_0(%arg0: i32) -> (i32, i32) {
    %c0_i32 = arith.constant 0 : i32
    %c0_i32_0 = arith.constant 0 : i32
    return %arg0, %c0_i32 : i32, i32
  }
  func.func @transform_1(%arg0: i32) -> (i32, i32) {
    %c0_i32 = arith.constant 0 : i32
    %c0_i32_0 = arith.constant 0 : i32
    %c0_i32_1 = arith.constant 0 : i32
    return %c0_i32, %c0_i32_0 : i32, i32
  }
  func.func @transform_2(%arg0: i32) -> (i32, i32) {
    %c0_i32 = arith.constant 0 : i32
    %c0_i32_0 = arith.constant 0 : i32
    %c0_i32_1 = arith.constant 0 : i32
    return %c0_i32, %c0_i32_0 : i32, i32
  }
  func.func @transform_3(%arg0: i32) -> (i32, i32) {
    %c0_i32 = arith.constant 0 : i32
    %c0_i32_0 = arith.constant 0 : i32
    return %arg0, %c0_i32 : i32, i32
  }
}

module attributes {stable_mosaic.version = 11 : i64} {
  func.func @_matmul_stats_kernel(%arg0: i32, %arg1: memref<64x128xbf16, #tpu.memory_space<vmem>>, %arg2: memref<128x128xbf16, #tpu.memory_space<vmem>>, %arg3: memref<64x128xf32, #tpu.memory_space<vmem>>, %arg4: memref<8x128xf32, #tpu.memory_space<vmem>>, %arg5: memref<8x128xf32, #tpu.memory_space<vmem>>) attributes {dimension_semantics = [#tpu.dimension_semantics<parallel>], iteration_bounds = array<i64: 2>, scalar_prefetch = 0 : i64, scratch_operands = 0 : i64, tpu.core_type = #tpu.core_type<tc>, window_params = [{transform_indices = @transform_0, window_bounds = array<i64: 64, 128>}, {pipeline_mode = #tpu.pipeline_mode<synchronous>, transform_indices = @transform_1, window_bounds = array<i64: 128, 128>}, {transform_indices = @transform_2, window_bounds = array<i64: 64, 128>}, {transform_indices = @transform_3, window_bounds = array<i64: 8, 128>}, {transform_indices = @transform_4, window_bounds = array<i64: 8, 128>}]} {
    %c0 = arith.constant 0 : index
    %c0_0 = arith.constant 0 : index
    %0 = vector.load %arg1[%c0, %c0_0] : memref<64x128xbf16, #tpu.memory_space<vmem>>, vector<64x128xbf16>
    %c0_1 = arith.constant 0 : index
    %c0_2 = arith.constant 0 : index
    %1 = vector.load %arg2[%c0_1, %c0_2] : memref<128x128xbf16, #tpu.memory_space<vmem>>, vector<128x128xbf16>
    %cst = arith.constant dense<0.000000e+00> : vector<64x128xf32>
    %2 = tpu.matmul %0, %1, %cst {dimension_numbers = #tpu.dot_dimension_numbers<[1], [0], [0], [1], [0, 0, 1, 1], [], []>} : vector<64x128xbf16>, vector<128x128xbf16>, vector<64x128xf32> -> vector<64x128xf32>
    %c0_3 = arith.constant 0 : index
    %c0_4 = arith.constant 0 : index
    %3 = vector.load %arg3[%c0_3, %c0_4] : memref<64x128xf32, #tpu.memory_space<vmem>>, vector<64x128xf32>
    tpu.vector_store %arg3[%c0_3, %c0_4], %2 {strides = array<i32>} : memref<64x128xf32, #tpu.memory_space<vmem>>, vector<64x128xf32>,
    %cst_5 = arith.constant dense<0.000000e+00> : vector<128xf32>
    %4 = vector.multi_reduction <add>, %2, %cst_5 [0] : vector<64x128xf32> to vector<128xf32>
    %5 = vector.shape_cast %4 : vector<128xf32> to vector<1x128xf32>
    %6 = arith.mulf %2, %2 : vector<64x128xf32>
    %cst_6 = arith.constant dense<0.000000e+00> : vector<128xf32>
    %7 = vector.multi_reduction <add>, %6, %cst_6 [0] : vector<64x128xf32> to vector<128xf32>
    %8 = vector.shape_cast %7 : vector<128xf32> to vector<1x128xf32>
    %9 = vector.shape_cast %5 : vector<1x128xf32> to vector<1x128xf32>
    %10 = vector.broadcast %9 : vector<1x128xf32> to vector<8x128xf32>
    %c0_7 = arith.constant 0 : index
    %c0_8 = arith.constant 0 : index
    %11 = vector.load %arg4[%c0_7, %c0_8] : memref<8x128xf32, #tpu.memory_space<vmem>>, vector<8x128xf32>
    tpu.vector_store %arg4[%c0_7, %c0_8], %10 {strides = array<i32>} : memref<8x128xf32, #tpu.memory_space<vmem>>, vector<8x128xf32>,
    %12 = vector.shape_cast %8 : vector<1x128xf32> to vector<1x128xf32>
    %13 = vector.broadcast %12 : vector<1x128xf32> to vector<8x128xf32>
    %c0_9 = arith.constant 0 : index
    %c0_10 = arith.constant 0 : index
    %14 = vector.load %arg5[%c0_9, %c0_10] : memref<8x128xf32, #tpu.memory_space<vmem>>, vector<8x128xf32>
    tpu.vector_store %arg5[%c0_9, %c0_10], %13 {strides = array<i32>} : memref<8x128xf32, #tpu.memory_space<vmem>>, vector<8x128xf32>,
    return
  }
  func.func @transform_0(%arg0: i32) -> (i32, i32) {
    %c0_i32 = arith.constant 0 : i32
    %c0_i32_0 = arith.constant 0 : i32
    return %arg0, %c0_i32 : i32, i32
  }
  func.func @transform_1(%arg0: i32) -> (i32, i32) {
    %c0_i32 = arith.constant 0 : i32
    %c0_i32_0 = arith.constant 0 : i32
    %c0_i32_1 = arith.constant 0 : i32
    return %c0_i32, %c0_i32_0 : i32, i32
  }
  func.func @transform_2(%arg0: i32) -> (i32, i32) {
    %c0_i32 = arith.constant 0 : i32
    %c0_i32_0 = arith.constant 0 : i32
    return %arg0, %c0_i32 : i32, i32
  }
  func.func @transform_3(%arg0: i32) -> (i32, i32) {
    %c0_i32 = arith.constant 0 : i32
    %c0_i32_0 = arith.constant 0 : i32
    return %arg0, %c0_i32 : i32, i32
  }
  func.func @transform_4(%arg0: i32) -> (i32, i32) {
    %c0_i32 = arith.constant 0 : i32
    %c0_i32_0 = arith.constant 0 : i32
    return %arg0, %c0_i32 : i32, i32
  }
}

module attributes {stable_mosaic.version = 11 : i64} {
  func.func @_dual_affine_add_relu_kernel(%arg0: i32, %arg1: memref<64x128xf32, #tpu.memory_space<vmem>>, %arg2: memref<1x128xf32, #tpu.memory_space<vmem>>, %arg3: memref<1x128xf32, #tpu.memory_space<vmem>>, %arg4: memref<64x128xf32, #tpu.memory_space<vmem>>, %arg5: memref<1x128xf32, #tpu.memory_space<vmem>>, %arg6: memref<1x128xf32, #tpu.memory_space<vmem>>, %arg7: memref<64x128xf32, #tpu.memory_space<vmem>>) attributes {dimension_semantics = [#tpu.dimension_semantics<parallel>], iteration_bounds = array<i64: 2>, scalar_prefetch = 0 : i64, scratch_operands = 0 : i64, tpu.core_type = #tpu.core_type<tc>, window_params = [{transform_indices = @transform_0, window_bounds = array<i64: 64, 128>}, {pipeline_mode = #tpu.pipeline_mode<synchronous>, transform_indices = @transform_1, window_bounds = array<i64: 1, 128>}, {pipeline_mode = #tpu.pipeline_mode<synchronous>, transform_indices = @transform_2, window_bounds = array<i64: 1, 128>}, {transform_indices = @transform_3, window_bounds = array<i64: 64, 128>}, {pipeline_mode = #tpu.pipeline_mode<synchronous>, transform_indices = @transform_4, window_bounds = array<i64: 1, 128>}, {pipeline_mode = #tpu.pipeline_mode<synchronous>, transform_indices = @transform_5, window_bounds = array<i64: 1, 128>}, {transform_indices = @transform_6, window_bounds = array<i64: 64, 128>}]} {
    %c0 = arith.constant 0 : index
    %c0_0 = arith.constant 0 : index
    %0 = vector.load %arg1[%c0, %c0_0] : memref<64x128xf32, #tpu.memory_space<vmem>>, vector<64x128xf32>
    %c0_1 = arith.constant 0 : index
    %c0_2 = arith.constant 0 : index
    %1 = vector.load %arg2[%c0_1, %c0_2] : memref<1x128xf32, #tpu.memory_space<vmem>>, vector<1x128xf32>
    %2 = vector.broadcast %1 : vector<1x128xf32> to vector<64x128xf32>
    %3 = arith.mulf %0, %2 : vector<64x128xf32>
    %c0_3 = arith.constant 0 : index
    %c0_4 = arith.constant 0 : index
    %4 = vector.load %arg3[%c0_3, %c0_4] : memref<1x128xf32, #tpu.memory_space<vmem>>, vector<1x128xf32>
    %5 = vector.broadcast %4 : vector<1x128xf32> to vector<64x128xf32>
    %6 = arith.addf %3, %5 : vector<64x128xf32>
    %c0_5 = arith.constant 0 : index
    %c0_6 = arith.constant 0 : index
    %7 = vector.load %arg4[%c0_5, %c0_6] : memref<64x128xf32, #tpu.memory_space<vmem>>, vector<64x128xf32>
    %c0_7 = arith.constant 0 : index
    %c0_8 = arith.constant 0 : index
    %8 = vector.load %arg5[%c0_7, %c0_8] : memref<1x128xf32, #tpu.memory_space<vmem>>, vector<1x128xf32>
    %9 = vector.broadcast %8 : vector<1x128xf32> to vector<64x128xf32>
    %10 = arith.mulf %7, %9 : vector<64x128xf32>
    %c0_9 = arith.constant 0 : index
    %c0_10 = arith.constant 0 : index
    %11 = vector.load %arg6[%c0_9, %c0_10] : memref<1x128xf32, #tpu.memory_space<vmem>>, vector<1x128xf32>
    %12 = vector.broadcast %11 : vector<1x128xf32> to vector<64x128xf32>
    %13 = arith.addf %10, %12 : vector<64x128xf32>
    %14 = arith.addf %6, %13 : vector<64x128xf32>
    %cst = arith.constant 0.000000e+00 : f32
    %15 = vector.broadcast %cst : f32 to vector<64x128xf32>
    %16 = arith.maximumf %14, %15 : vector<64x128xf32>
    %c0_11 = arith.constant 0 : index
    %c0_12 = arith.constant 0 : index
    %17 = vector.load %arg7[%c0_11, %c0_12] : memref<64x128xf32, #tpu.memory_space<vmem>>, vector<64x128xf32>
    tpu.vector_store %arg7[%c0_11, %c0_12], %16 {strides = array<i32>} : memref<64x128xf32, #tpu.memory_space<vmem>>, vector<64x128xf32>,
    return
  }
  func.func @transform_0(%arg0: i32) -> (i32, i32) {
    %c0_i32 = arith.constant 0 : i32
    %c0_i32_0 = arith.constant 0 : i32
    return %arg0, %c0_i32 : i32, i32
  }
  func.func @transform_1(%arg0: i32) -> (i32, i32) {
    %c0_i32 = arith.constant 0 : i32
    %c0_i32_0 = arith.constant 0 : i32
    %c0_i32_1 = arith.constant 0 : i32
    return %c0_i32, %c0_i32_0 : i32, i32
  }
  func.func @transform_2(%arg0: i32) -> (i32, i32) {
    %c0_i32 = arith.constant 0 : i32
    %c0_i32_0 = arith.constant 0 : i32
    %c0_i32_1 = arith.constant 0 : i32
    return %c0_i32, %c0_i32_0 : i32, i32
  }
  func.func @transform_3(%arg0: i32) -> (i32, i32) {
    %c0_i32 = arith.constant 0 : i32
    %c0_i32_0 = arith.constant 0 : i32
    return %arg0, %c0_i32 : i32, i32
  }
  func.func @transform_4(%arg0: i32) -> (i32, i32) {
    %c0_i32 = arith.constant 0 : i32
    %c0_i32_0 = arith.constant 0 : i32
    %c0_i32_1 = arith.constant 0 : i32
    return %c0_i32, %c0_i32_0 : i32, i32
  }
  func.func @transform_5(%arg0: i32) -> (i32, i32) {
    %c0_i32 = arith.constant 0 : i32
    %c0_i32_0 = arith.constant 0 : i32
    %c0_i32_1 = arith.constant 0 : i32
    return %c0_i32, %c0_i32_0 : i32, i32
  }
  func.func @transform_6(%arg0: i32) -> (i32, i32) {
    %c0_i32 = arith.constant 0 : i32
    %c0_i32_0 = arith.constant 0 : i32
    return %arg0, %c0_i32 : i32, i32
  }
}

</mosaic_0001>

<bundles_post_ra>
// kernel: basic_block_forward.5
= control target key start
LH: loop header
LB: loop body
LE: loop exit
PB: predicated region body
PF: predicated region fallthrough
CT: control target
= control target key end

     0   :  { %s404_s12 = smov 0   ;;  %s431_s0 = inlined_call_operand.vmem [shape: f32[128,128], index: 0, kind: input, shape index: {}]   ;;  %s432_s1 = inlined_call_operand.vmem [shape: f32[1,128], index: 1, kind: input, shape index: {}]   ;;  %s433_s2 = inlined_call_operand.vmem [shape: f32[1,128], index: 2, kind: input, shape index: {}]   ;;  %s434_s3 = inlined_call_operand.vmem [shape: bf16[128,128], index: 3, kind: output, shape index: {}]  }
   0x1 LB: > { %s316_s13 = sadd.s32 4294967295, %s382_s12   ;;  %p320_p0 = scmp.ge.s32.totalorder %s382_s12, 1  ;;  %s382_s12 = sphi %s404_s12, %s13_s12  }
   0x2   : > { %p138_p1 = scmp.lt.s32.totalorder %s382_s12, 3 }
   0x4   : > { %p139_p2 = pnand %p320_p0, %p138_p1 }
   0x5   : > { %s321_s14 = sshll.u32 (!%p139_p2), %s316_s13, 3 }
   0x6   : > { %142 = sbr.rel (%p139_p2) target bundleno = 27 (0x1b), region = 32  ;;  %p163_p3 = scmp.lt.s32.totalorder (!%p139_p2), %s321_s14, 15 }
   0xb   : > { %s436_s14 = smov (!%p163_p3, %s321_s14), 15  ;;  %v325_v0 = vld [vmem:[%s432_s1] ss:$0 sm:$0xff] }
   0xc   : > { %s322_s15 = sshll.u32 %s436_s14, 3  ;;  %v326_v1 = vld [vmem:[%s433_s2] ss:$0 sm:$0xff]  ;;  %s324_s23 = sshll.u32 %s436_s14, 2 }
   0xd   : > { %s166_s20 = scalar_lea.vmem %s431_s0, %s322_s15  ;;  %s172_s26 = scalar_lea.vmem %s434_s3, %s324_s23 }
   0xe   : > { %v174_v2 = vld [vmem:[%s166_s20] sm:$0xff]  ;;  %v175_v3 = vld [vmem:[%s166_s20 + $0x8] sm:$0xff]  ;;  %v176_v4 = vld [vmem:[%s166_s20 + $0x10] sm:$0xff] }
   0xf   : > { %v189_v5 = vmul.f32 %v325_v0, %v174_v2  ;;  %v190_v6 = vmul.f32 %v325_v0, %v175_v3  ;;  %v177_v7 = vld [vmem:[%s166_s20 + $0x18] sm:$0xff]  ;;  %v191_v8 = vmul.f32 %v325_v0, %v176_v4  ;;  %v178_v9 = vld [vmem:[%s166_s20 + $0x20] sm:$0xff]  ;;  %v179_v10 = vld [vmem:[%s166_s20 + $0x28] sm:$0xff] }
  0x10   : > { %v192_v11 = vmul.f32 %v325_v0, %v177_v7  ;;  %v193_v12 = vmul.f32 %v325_v0, %v178_v9  ;;  %v194_v13 = vmul.f32 %v325_v0, %v179_v10  ;;  %v180_v14 = vld [vmem:[%s166_s20 + $0x30] sm:$0xff]  ;;  %v181_v15 = vld [vmem:[%s166_s20 + $0x38] sm:$0xff] }
  0x11   : > { %v204_v16 = vadd.f32 %v326_v1, %v189_v5  ;;  %v205_v17 = vadd.f32 %v326_v1, %v190_v6  ;;  %v206_v18 = vadd.f32 %v326_v1, %v191_v8  ;;  %v195_v19 = vmul.f32 %v325_v0, %v180_v14 }
  0x12   : > { %v207_v20 = vadd.f32 %v326_v1, %v192_v11  ;;  %v208_v21 = vadd.f32 %v326_v1, %v193_v12  ;;  %v209_v22 = vadd.f32 %v326_v1, %v194_v13  ;;  %v196_v23 = vmul.f32 %v325_v0, %v181_v15 }
  0x13   : > { %v212_v24 = vmax.f32 %v204_v16, 0.0  ;;  %v213_v25 = vmax.f32 %v205_v17, 0.0  ;;  %v214_v26 = vmax.f32 %v206_v18, 0.0  ;;  %v210_v27 = vadd.f32 %v326_v1, %v195_v19 }
  0x14   : > { %v215_v28 = vmax.f32 %v207_v20, 0.0  ;;  %v216_v29 = vmax.f32 %v208_v21, 0.0  ;;  %v217_v30 = vmax.f32 %v209_v22, 0.0  ;;  %v211_v31 = vadd.f32 %v326_v1, %v196_v23 }
  0x15   : > { %v348_v32 = vpack.c.bf16 %v213_v25, %v212_v24  ;;  %v218_v33 = vmax.f32 %v210_v27, 0.0 }
  0x16   : > { %v353_v34 = vpack.c.bf16 %v215_v28, %v214_v26  ;;  %v358_v35 = vpack.c.bf16 %v217_v30, %v216_v29  ;;  %v219_v36 = vmax.f32 %v211_v31, 0.0 }
  0x17   : > { %349 = vst [vmem:[%s172_s26] sm:$0xff] %v348_v32  }
  0x18   : > { %365 = vst [vmem:[%s172_s26 + $0x8] sm:$0xff] %v353_v34   ;;  %366 = vst [vmem:[%s172_s26 + $0x10] sm:$0xff] %v358_v35   ;;  %v363_v37 = vpack.c.bf16 %v219_v36, %v218_v33 }
  0x1a   : > { %367 = vst [vmem:[%s172_s26 + $0x18] sm:$0xff] %v363_v37  }
  0x1b PF: > { %s13_s12 = sadd.s32 1, %s382_s12  }
  0x1c   : > { %p10_p4 = scmp.ge.s32.totalorder %s13_s12, 4  }
  0x1e   :  { %12 = sbr.rel (!%p10_p4) target bundleno = 1 (0x1), region = 62 }

// kernel: basic_block_forward.4
= control target key start
LH: loop header
LB: loop body
LE: loop exit
PB: predicated region body
PF: predicated region fallthrough
CT: control target
= control target key end

     0   :  { %s1146_s27 = smov 0   ;;  %s1261_s0 = inlined_call_operand.vmem [shape: bf16[128,128], index: 0, kind: input, shape index: {}]   ;;  %s1262_s1 = inlined_call_operand.vmem [shape: bf16[128,128], index: 1, kind: input, shape index: {}]   ;;  %s1263_s2 = inlined_call_operand.vmem [shape: bf16[128,128], index: 2, kind: input, shape index: {}]   ;;  %s1264_s3 = inlined_call_operand.vmem [shape: f32[128,128], index: 3, kind: output, shape index: {0}]   ;;  %s1265_s4 = inlined_call_operand.vmem [shape: f32[128,128], index: 4, kind: output, shape index: {1}]   ;;  %s1266_s5 = inlined_call_operand.vmem [shape: f32[16,128], index: 5, kind: output, shape index: {2}]   ;;  %s1267_s6 = inlined_call_operand.vmem [shape: f32[16,128], index: 6, kind: output, shape index: {3}]   ;;  %s1268_s7 = inlined_call_operand.vmem [shape: f32[16,128], index: 7, kind: output, shape index: {4}]   ;;  %s1269_s8 = inlined_call_operand.vmem [shape: f32[16,128], index: 8, kind: output, shape index: {5}]  }
   0x1 LB: > { %s1152_s28 = sadd.s32 4294967295, %s1099_s27   ;;  %p960_p0 = scmp.ge.s32.totalorder %s1099_s27, 1  ;;  %s1099_s27 = sphi %s1146_s27, %s19_s27  }
   0x2   : > { %p274_p1 = scmp.lt.s32.totalorder %s1099_s27, 3 }
   0x4   : > { %p275_p2 = pnand %p960_p0, %p274_p1 }
   0x5   : > { %s961_s9 = sshll.u32 (!%p275_p2), %s1152_s28, 3  ;;  %p347_p4 = scmp.lt.s32.totalorder (!%p275_p2), %s1152_s28, 1 }
   0x6   : > { %278 = sbr.rel (%p275_p2) target bundleno = 273 (0x111), region = 32  ;;  %p330_p3 = scmp.lt.s32.totalorder (!%p275_p2), %s961_s9, 15 }
   0xb   : > { %v1073_v0 = vld [vmem:[%s1262_s1 + $0x38] sm:$0xff]   ;;  %v1075_v2 = vld [vmem:[%s1262_s1 + $0x30] sm:$0xff]   ;;  %v1077_v4 = vld [vmem:[%s1262_s1 + $0x28] sm:$0xff]   ;;  %s1271_s9 = smov (!%p330_p3, %s961_s9), 15  ;;  %s1273_s28 = smov (!%p347_p4, %s1152_s28), 1 }
   0xc   : > { %v1074_v1 = vld [vmem:[%s1263_s2 + $0x38] sm:$0xff]   ;;  %1017 = vmatprep.subr.bf16.mxu0 %v1073_v0  ;;  %v1076_v3 = vld [vmem:[%s1263_s2 + $0x30] sm:$0xff]   ;;  %v1078_v5 = vld [vmem:[%s1263_s2 + $0x28] sm:$0xff]   ;;  %s962_s24 = sshll.u32 %s1271_s9, 2  ;;  %s964_s25 = sshll.u32 %s1271_s9, 3 }
   0xd   : > { %1041 = vmatprep.subr.bf16.mxu1 %v1074_v1  ;;  %1018 = vmatpush3.bf16.msra.mxu0 %v1073_v0  ;;  %v1079_v6 = vld [vmem:[%s1262_s1 + $0x20] sm:$0xff]   ;;  %v1081_v8 = vld [vmem:[%s1262_s1 + $0x18] sm:$0xff]   ;;  %s1193_s12 = scalar_lea.vmem %s1261_s0, %s962_s24  ;;  %v1083_v10 = vld [vmem:[%s1262_s1 + $0x10] sm:$0xff]   ;;  %s1221_s30 = scalar_lea.vmem %s1264_s3, %s964_s25 }
   0xe   : > { %1042 = vmatpush3.bf16.msra.mxu1 %v1074_v1  ;;  %1019 = vmatprep.subr.bf16.mxu0 %v1075_v2  ;;  %v1080_v7 = vld [vmem:[%s1263_s2 + $0x20] sm:$0xff]   ;;  %v1082_v9 = vld [vmem:[%s1263_s2 + $0x18] sm:$0xff]   ;;  %v1084_v12 = vld [vmem:[%s1263_s2 + $0x10] sm:$0xff]   ;;  %s1226_s13 = scalar_lea.vmem %s1265_s4, %s964_s25  ;;  %s967_s9 = sshll.u32 %s1273_s28, 3 }
   0xf   : > { %1043 = vmatprep.subr.bf16.mxu1 %v1076_v3  ;;  %v1089_v11 = vld [vmem:[%s1193_s12] sm:$0xff]   ;;  %v1085_v13 = vld [vmem:[%s1262_s1 + $0x8] sm:$0xff]   ;;  %v1091_v18 = vld [vmem:[%s1193_s12 + $0x10] sm:$0xff]   ;;  %s350_s15 = scalar_lea.vmem %s1266_s5, %s967_s9  ;;  %s358_s18 = scalar_lea.vmem %s1268_s7, %s967_s9 }
  0x10   : > { %1033 = vmatprep.mubr.bf16.mxu0 %v1089_v11  ;;  %1057 = vmatprep.mubr.bf16.mxu1 %v1089_v11  ;;  %v1086_v14 = vld [vmem:[%s1263_s2 + $0x8] sm:$0xff]   ;;  %v1087_v15 = vld [vmem:[%s1262_s1] sm:$0xff]   ;;  %v1092_v19 = vld [vmem:[%s1193_s12 + $0x18] sm:$0xff]   ;;  %s354_s20 = scalar_lea.vmem %s1267_s6, %s967_s9  ;;  %s362_s23 = scalar_lea.vmem %s1269_s8, %s967_s9 }
  0x11   : > { %1020 = vmatpush3.bf16.msra.mxu0 %v1075_v2  ;;  %v1088_v16 = vld [vmem:[%s1263_s2] sm:$0xff]   ;;  %v1090_v17 = vld [vmem:[%s1193_s12 + $0x8] sm:$0xff]  }
  0x12   : > { %1044 = vmatpush3.bf16.msra.mxu1 %v1076_v3  ;;  %1021 = vmatprep.subr.bf16.mxu0 %v1077_v4 }
  0x13   : > { %1045 = vmatprep.subr.bf16.mxu1 %v1078_v5 }
  0x15   : > { %1022 = vmatpush3.bf16.msra.mxu0 %v1077_v4 }
  0x16   : > { %1046 = vmatpush3.bf16.msra.mxu1 %v1078_v5  ;;  %1023 = vmatprep.subr.bf16.mxu0 %v1079_v6 }
  0x17   : > { %1047 = vmatprep.subr.bf16.mxu1 %v1080_v7 }
  0x19   : > { %1024 = vmatpush3.bf16.msra.mxu0 %v1079_v6 }
  0x1a   : > { %1048 = vmatpush3.bf16.msra.mxu1 %v1080_v7  ;;  %1025 = vmatprep.subr.bf16.mxu0 %v1081_v8 }
  0x1b   : > { %1049 = vmatprep.subr.bf16.mxu1 %v1082_v9 }
  0x1d   : > { %1026 = vmatpush3.bf16.msra.mxu0 %v1081_v8 }
  0x1e   : > { %1050 = vmatpush3.bf16.msra.mxu1 %v1082_v9  ;;  %1027 = vmatprep.subr.bf16.mxu0 %v1083_v10 }
  0x1f   : > { %1051 = vmatprep.subr.bf16.mxu1 %v1084_v12 }
  0x21   : > { %1028 = vmatpush3.bf16.msra.mxu0 %v1083_v10 }
  0x22   : > { %1052 = vmatpush3.bf16.msra.mxu1 %v1084_v12  ;;  %1029 = vmatprep.subr.bf16.mxu0 %v1085_v13 }
  0x23   : > { %1053 = vmatprep.subr.bf16.mxu1 %v1086_v14 }
  0x25   : > { %1030 = vmatpush3.bf16.msra.mxu0 %v1085_v13 }
  0x26   : > { %1054 = vmatpush3.bf16.msra.mxu1 %v1086_v14  ;;  %1031 = vmatprep.subr.bf16.mxu0 %v1087_v15 }
  0x27   : > { %1055 = vmatprep.subr.bf16.mxu1 %v1088_v16 }
  0x29   : > { %1032 = vmatpush3.bf16.msra.mxu0 %v1087_v15 }
  0x2a   : > { %1056 = vmatpush3.bf16.msra.mxu1 %v1088_v16 }
  0x2c   : > { %1034 = vmatmul.mubr.bf16.vlgmr.msra.gmra.mxu0 %v1090_v17 }
  0x2d   : > { %1058 = vmatmul.mubr.bf16.vlgmr.msra.gmra.mxu1 %v1090_v17  ;;  %1037 = vmatprep.mubr.bf16.mxu0 %v1091_v18 }
  0x2e   : > { %1061 = vmatprep.mubr.bf16.mxu1 %v1091_v18 }
  0x34   : > { %1038 = vmatmul.mubr.bf16.gmra.mxu0 %v1092_v19 }
  0x35   : > { %1062 = vmatmul.mubr.bf16.gmra.mxu1 %v1092_v19 }
  0xec   : > { %v1035_v20 = vpop.f32.mrf.mxu0 }
  0xed   : > { %527 = vst [vmem:[%s1221_s30 + $0x10] sm:$0xff] %v1035_v20  ;;  %v1059_v21 = vpop.f32.mrf.mxu1  ;;  %v549_v35 = vmul.f32 %v1035_v20, %v1035_v20 }
  0xee   : > { %700 = vst [vmem:[%s1226_s13 + $0x10] sm:$0xff] %v1059_v21  ;;  %v494_v22 = vpop.f32.mrf.mxu0  ;;  %v722_v39 = vmul.f32 %v1059_v21, %v1059_v21 }
  0xef   : > { %525 = vst [vmem:[%s1221_s30] sm:$0xff] %v494_v22  ;;  %v667_v23 = vpop.f32.mrf.mxu1  ;;  %v547_v27 = vmul.f32 %v494_v22, %v494_v22 }
  0xf0   : > { %698 = vst [vmem:[%s1226_s13] sm:$0xff] %v667_v23  ;;  %v1036_v24 = vpop.f32.mrf.mxu0  ;;  %v720_v31 = vmul.f32 %v667_v23, %v667_v23 }
  0xf1   : > { %528 = vst [vmem:[%s1221_s30 + $0x18] sm:$0xff] %v1036_v24  ;;  %v1060_v25 = vpop.f32.mrf.mxu1  ;;  %v550_v43 = vmul.f32 %v1036_v24, %v1036_v24 }
  0xf2   : > { %701 = vst [vmem:[%s1226_s13 + $0x18] sm:$0xff] %v1060_v25  ;;  %v497_v26 = vpop.f32.mrf.mxu0  ;;  %v723_v47 = vmul.f32 %v1060_v25, %v1060_v25 }
  0xf3   : > { %526 = vst [vmem:[%s1221_s30 + $0x8] sm:$0xff] %v497_v26  ;;  %v533_v28 = vadd.f32 %v497_v26, %v494_v22  ;;  %v548_v29 = vmul.f32 %v497_v26, %v497_v26  ;;  %v670_v30 = vpop.f32.mrf.mxu1 }
  0xf4   : > { %699 = vst [vmem:[%s1226_s13 + $0x8] sm:$0xff] %v670_v30  ;;  %v706_v32 = vadd.f32 %v670_v30, %v667_v23  ;;  %v721_v33 = vmul.f32 %v670_v30, %v670_v30  ;;  %v1039_v34 = vpop.f32.mrf.mxu0 }
  0xf5   : > { %v534_v36 = vadd.f32 %v1035_v20, %v533_v28  ;;  %v555_v37 = vadd.f32 %v548_v29, %v547_v27  ;;  %531 = vst [vmem:[%s1221_s30 + $0x30] sm:$0xff] %v1039_v34  ;;  %v1063_v38 = vpop.f32.mrf.mxu1  ;;  %v553_v2 = vmul.f32 %v1039_v34, %v1039_v34 }
  0xf6   : > { %v707_v40 = vadd.f32 %v1059_v21, %v706_v32  ;;  %v728_v41 = vadd.f32 %v721_v33, %v720_v31  ;;  %704 = vst [vmem:[%s1226_s13 + $0x30] sm:$0xff] %v1063_v38  ;;  %v510_v42 = vpop.f32.mrf.mxu0  ;;  %v726_v5 = vmul.f32 %v1063_v38, %v1063_v38 }
  0xf7   : > { %v556_v44 = vadd.f32 %v555_v37, %v549_v35  ;;  %529 = vst [vmem:[%s1221_s30 + $0x20] sm:$0xff] %v510_v42  ;;  %v535_v45 = vadd.f32 %v1036_v24, %v534_v36  ;;  %v683_v46 = vpop.f32.mrf.mxu1  ;;  %v551_v52 = vmul.f32 %v510_v42, %v510_v42 }
  0xf8   : > { %v729_v48 = vadd.f32 %v728_v41, %v722_v39  ;;  %702 = vst [vmem:[%s1226_s13 + $0x20] sm:$0xff] %v683_v46  ;;  %v708_v49 = vadd.f32 %v1060_v25, %v707_v40  ;;  %v1040_v50 = vpop.f32.mrf.mxu0  ;;  %v724_v56 = vmul.f32 %v683_v46, %v683_v46 }
  0xf9   : > { %v536_v51 = vadd.f32 %v535_v45, %v510_v42  ;;  %v557_v53 = vadd.f32 %v556_v44, %v550_v43  ;;  %532 = vst [vmem:[%s1221_s30 + $0x38] sm:$0xff] %v1040_v50  ;;  %v1064_v54 = vpop.f32.mrf.mxu1  ;;  %v554_v8 = vmul.f32 %v1040_v50, %v1040_v50 }
  0xfa   : > { %v709_v55 = vadd.f32 %v708_v49, %v683_v46  ;;  %v730_v57 = vadd.f32 %v729_v48, %v723_v47  ;;  %705 = vst [vmem:[%s1226_s13 + $0x38] sm:$0xff] %v1064_v54  ;;  %v513_v58 = vpop.f32.mrf.mxu0  ;;  %v727_v11 = vmul.f32 %v1064_v54, %v1064_v54 }
  0xfb   : > { %v558_v59 = vadd.f32 %v557_v53, %v551_v52  ;;  %530 = vst [vmem:[%s1221_s30 + $0x28] sm:$0xff] %v513_v58  ;;  %v537_v60 = vadd.f32 %v536_v51, %v513_v58  ;;  %v552_v61 = vmul.f32 %v513_v58, %v513_v58  ;;  %v686_v62 = vpop.f32.mrf.mxu1 }
  0xfc   : > { %v731_v63 = vadd.f32 %v730_v57, %v724_v56  ;;  %703 = vst [vmem:[%s1226_s13 + $0x28] sm:$0xff] %v686_v62  ;;  %v710_v0 = vadd.f32 %v709_v55, %v686_v62  ;;  %v725_v1 = vmul.f32 %v686_v62, %v686_v62 }
  0xfd   : > { %v538_v3 = vadd.f32 %v1039_v34, %v537_v60  ;;  %v559_v4 = vadd.f32 %v558_v59, %v552_v61 }
  0xfe   : > { %v711_v6 = vadd.f32 %v1063_v38, %v710_v0  ;;  %v732_v7 = vadd.f32 %v731_v63, %v725_v1 }
  0xff   : > { %v539_v9 = vadd.f32 %v1040_v50, %v538_v3  ;;  %v560_v10 = vadd.f32 %v559_v4, %v553_v2 }
 0x100   : > { %v712_v12 = vadd.f32 %v1064_v54, %v711_v6  ;;  %v733_v13 = vadd.f32 %v732_v7, %v726_v5 }
 0x101   : > { %v540_v14 = vrot.slane %v539_v9, 4  ;;  %v561_v15 = vadd.f32 %v560_v10, %v554_v8 }
 0x102   : > { %v713_v16 = vrot.slane %v712_v12, 4  ;;  %v734_v17 = vadd.f32 %v733_v13, %v727_v11 }
 0x103   : > { %v541_v18 = vadd.f32 %v540_v14, %v539_v9  ;;  %v562_v19 = vrot.slane %v561_v15, 4 }
 0x104   : > { %v714_v20 = vadd.f32 %v713_v16, %v712_v12  ;;  %v735_v21 = vrot.slane %v734_v17, 4 }
 0x105   : > { %v542_v22 = vrot.slane %v541_v18, 2  ;;  %v563_v23 = vadd.f32 %v562_v19, %v561_v15 }
 0x106   : > { %v715_v24 = vrot.slane %v714_v20, 2  ;;  %v736_v25 = vadd.f32 %v735_v21, %v734_v17 }
 0x107   : > { %v543_v26 = vadd.f32 %v542_v22, %v541_v18  ;;  %v564_v27 = vrot.slane %v563_v23, 2 }
 0x108   : > { %v716_v28 = vadd.f32 %v715_v24, %v714_v20  ;;  %v737_v29 = vrot.slane %v736_v25, 2 }
 0x109   : > { %v544_v30 = vrot.slane %v543_v26, 1  ;;  %v565_v31 = vadd.f32 %v564_v27, %v563_v23 }
 0x10a   : > { %v717_v32 = vrot.slane %v716_v28, 1  ;;  %v738_v33 = vadd.f32 %v737_v29, %v736_v25 }
 0x10b   : > { %v545_v34 = vadd.f32 %v544_v30, %v543_v26  ;;  %v566_v35 = vrot.slane %v565_v31, 1 }
 0x10c   : > { %v718_v36 = vadd.f32 %v717_v32, %v716_v28  ;;  %v739_v37 = vrot.slane %v738_v33, 1 }
 0x10d   : > { %546 = vst [vmem:[%s350_s15] sm:$0xff] %v545_v34  ;;  %v567_v38 = vadd.f32 %v566_v35, %v565_v31 }
 0x10e   : > { %719 = vst [vmem:[%s358_s18] sm:$0xff] %v718_v36  ;;  %v740_v39 = vadd.f32 %v739_v37, %v738_v33 }
 0x10f   : > { %568 = vst [vmem:[%s354_s20] sm:$0xff] %v567_v38 }
 0x110   : > { %741 = vst [vmem:[%s362_s23] sm:$0xff] %v740_v39 }
 0x111 PF: > { %s19_s27 = sadd.s32 1, %s1099_s27  }
 0x112   : > { %p16_p5 = scmp.ge.s32.totalorder %s19_s27, 4  }
 0x114   :  { %18 = sbr.rel (!%p16_p5) target bundleno = 1 (0x1), region = 122 }

// kernel: basic_block_forward.7
= control target key start
LH: loop header
LB: loop body
LE: loop exit
PB: predicated region body
PF: predicated region fallthrough
CT: control target
= control target key end

     0   :  { %s513_s21 = smov 0   ;;  %s600_s0 = inlined_call_operand.vmem [shape: f32[128,128], index: 0, kind: input, shape index: {}]   ;;  %s601_s1 = inlined_call_operand.vmem [shape: f32[1,128], index: 1, kind: input, shape index: {}]   ;;  %s602_s2 = inlined_call_operand.vmem [shape: f32[1,128], index: 2, kind: input, shape index: {}]   ;;  %s603_s3 = inlined_call_operand.vmem [shape: f32[128,128], index: 3, kind: input, shape index: {}]   ;;  %s604_s4 = inlined_call_operand.vmem [shape: f32[1,128], index: 4, kind: input, shape index: {}]   ;;  %s605_s5 = inlined_call_operand.vmem [shape: f32[1,128], index: 5, kind: input, shape index: {}]   ;;  %s606_s6 = inlined_call_operand.vmem [shape: f32[128,128], index: 6, kind: output, shape index: {}]  }
   0x1 LB: > { %s445_s22 = sadd.s32 4294967295, %s476_s21   ;;  %p449_p0 = scmp.ge.s32.totalorder %s476_s21, 1  ;;  %s476_s21 = sphi %s513_s21, %s16_s21  }
   0x2   : > { %p224_p1 = scmp.lt.s32.totalorder %s476_s21, 3 }
   0x4   : > { %p225_p2 = pnand %p449_p0, %p224_p1 }
   0x5   : > { %s450_s23 = sshll.u32 (!%p225_p2), %s445_s22, 3 }
   0x6   : > { %228 = sbr.rel (%p225_p2) target bundleno = 33 (0x21), region = 44  ;;  %p260_p3 = scmp.lt.s32.totalorder (!%p225_p2), %s450_s23, 15 }
   0xb   : > { %s608_s23 = smov (!%p260_p3, %s450_s23), 15  ;;  %v456_v0 = vld [vmem:[%s601_s1] ss:$0 sm:$0xff] }
   0xc   : > { %s521_s24 = sshll.u32 %s608_s23, 3  ;;  %v458_v1 = vld [vmem:[%s604_s4] ss:$0 sm:$0xff] }
   0xd   : > { %s533_s7 = scalar_lea.vmem %s600_s0, %s521_s24  ;;  %s539_s10 = scalar_lea.vmem %s603_s3, %s521_s24  ;;  %v544_v2 = vld [vmem:[%s602_s2] ss:$0 sm:$0xff] }
   0xe   : > { %v549_v3 = vld [vmem:[%s605_s5] ss:$0 sm:$0xff]  ;;  %v278_v6 = vld [vmem:[%s533_s7 + $0x8] sm:$0xff]  ;;  %v279_v11 = vld [vmem:[%s533_s7 + $0x10] sm:$0xff]  ;;  %s574_s17 = scalar_lea.vmem %s606_s6, %s521_s24 }
   0xf   : > { %v277_v4 = vld [vmem:[%s533_s7] sm:$0xff]  ;;  %v293_v9 = vmul.f32 %v456_v0, %v278_v6  ;;  %v316_v10 = vld [vmem:[%s539_s10 + $0x8] sm:$0xff]  ;;  %v317_v12 = vld [vmem:[%s539_s10 + $0x10] sm:$0xff]  ;;  %v294_v14 = vmul.f32 %v456_v0, %v279_v11 }
  0x10   : > { %v315_v5 = vld [vmem:[%s539_s10] sm:$0xff]  ;;  %v292_v7 = vmul.f32 %v456_v0, %v277_v4  ;;  %v331_v13 = vmul.f32 %v458_v1, %v316_v10  ;;  %v332_v15 = vmul.f32 %v458_v1, %v317_v12  ;;  %v280_v16 = vld [vmem:[%s533_s7 + $0x18] sm:$0xff]  ;;  %v282_v24 = vld [vmem:[%s533_s7 + $0x28] sm:$0xff] }
  0x11   : > { %v330_v8 = vmul.f32 %v458_v1, %v315_v5  ;;  %v318_v17 = vld [vmem:[%s539_s10 + $0x18] sm:$0xff]  ;;  %v281_v18 = vld [vmem:[%s533_s7 + $0x20] sm:$0xff]  ;;  %v308_v21 = vadd.f32 %v544_v2, %v293_v9  ;;  %v295_v22 = vmul.f32 %v456_v0, %v280_v16  ;;  %v309_v26 = vadd.f32 %v544_v2, %v294_v14  ;;  %v320_v29 = vld [vmem:[%s539_s10 + $0x28] sm:$0xff] }
  0x12   : > { %v307_v19 = vadd.f32 %v544_v2, %v292_v7  ;;  %v319_v23 = vld [vmem:[%s539_s10 + $0x20] sm:$0xff]  ;;  %v346_v25 = vadd.f32 %v549_v3, %v331_v13  ;;  %v347_v27 = vadd.f32 %v549_v3, %v332_v15  ;;  %v333_v28 = vmul.f32 %v458_v1, %v318_v17  ;;  %v283_v38 = vld [vmem:[%s533_s7 + $0x30] sm:$0xff]  ;;  %v284_v44 = vld [vmem:[%s533_s7 + $0x38] sm:$0xff] }
  0x13   : > { %v345_v20 = vadd.f32 %v549_v3, %v330_v8  ;;  %v310_v31 = vadd.f32 %v544_v2, %v295_v22  ;;  %v296_v32 = vmul.f32 %v456_v0, %v281_v18  ;;  %v334_v33 = vmul.f32 %v458_v1, %v319_v23  ;;  %v321_v39 = vld [vmem:[%s539_s10 + $0x30] sm:$0xff]  ;;  %v322_v45 = vld [vmem:[%s539_s10 + $0x38] sm:$0xff] }
  0x14   : > { %v354_v34 = vadd.f32 %v346_v25, %v308_v21  ;;  %v355_v35 = vadd.f32 %v347_v27, %v309_v26  ;;  %v348_v36 = vadd.f32 %v549_v3, %v333_v28  ;;  %v297_v37 = vmul.f32 %v456_v0, %v282_v24 }
  0x15   : > { %v353_v30 = vadd.f32 %v345_v20, %v307_v19  ;;  %v311_v41 = vadd.f32 %v544_v2, %v296_v32  ;;  %v349_v42 = vadd.f32 %v549_v3, %v334_v33  ;;  %v335_v43 = vmul.f32 %v458_v1, %v320_v29 }
  0x16   : > { %v362_v46 = vmax.f32 %v354_v34, 0.0  ;;  %v363_v47 = vmax.f32 %v355_v35, 0.0  ;;  %v356_v48 = vadd.f32 %v348_v36, %v310_v31  ;;  %v312_v49 = vadd.f32 %v544_v2, %v297_v37 }
  0x17   : > { %v361_v40 = vmax.f32 %v353_v30, 0.0  ;;  %v357_v50 = vadd.f32 %v349_v42, %v311_v41  ;;  %v350_v51 = vadd.f32 %v549_v3, %v335_v43  ;;  %v298_v52 = vmul.f32 %v456_v0, %v283_v38 }
  0x18   : > { %v336_v53 = vmul.f32 %v458_v1, %v321_v39  ;;  %370 = vst [vmem:[%s574_s17 + $0x8] sm:$0xff] %v362_v46  ;;  %371 = vst [vmem:[%s574_s17 + $0x10] sm:$0xff] %v363_v47  ;;  %v364_v54 = vmax.f32 %v356_v48, 0.0  ;;  %v299_v55 = vmul.f32 %v456_v0, %v284_v44  ;;  %v337_v56 = vmul.f32 %v458_v1, %v322_v45 }
  0x19   : > { %369 = vst [vmem:[%s574_s17] sm:$0xff] %v361_v40  ;;  %v365_v57 = vmax.f32 %v357_v50, 0.0  ;;  %v358_v58 = vadd.f32 %v350_v51, %v312_v49  ;;  %v313_v59 = vadd.f32 %v544_v2, %v298_v52 }
  0x1a   : > { %v351_v60 = vadd.f32 %v549_v3, %v336_v53  ;;  %372 = vst [vmem:[%s574_s17 + $0x18] sm:$0xff] %v364_v54  ;;  %v314_v61 = vadd.f32 %v544_v2, %v299_v55  ;;  %v352_v62 = vadd.f32 %v549_v3, %v337_v56 }
  0x1b   : > { %373 = vst [vmem:[%s574_s17 + $0x20] sm:$0xff] %v365_v57  ;;  %v366_v63 = vmax.f32 %v358_v58, 0.0 }
  0x1c   : > { %v359_v4 = vadd.f32 %v351_v60, %v313_v59  ;;  %v360_v5 = vadd.f32 %v352_v62, %v314_v61 }
  0x1d   : > { %374 = vst [vmem:[%s574_s17 + $0x28] sm:$0xff] %v366_v63 }
  0x1e   : > { %v367_v0 = vmax.f32 %v359_v4, 0.0  ;;  %v368_v6 = vmax.f32 %v360_v5, 0.0 }
  0x20   : > { %375 = vst [vmem:[%s574_s17 + $0x30] sm:$0xff] %v367_v0  ;;  %376 = vst [vmem:[%s574_s17 + $0x38] sm:$0xff] %v368_v6 }
  0x21 PF: > { %s16_s21 = sadd.s32 1, %s476_s21  }
  0x22   : > { %p13_p4 = scmp.ge.s32.totalorder %s16_s21, 4  }
  0x24   :  { %15 = sbr.rel (!%p13_p4) target bundleno = 1 (0x1), region = 77 }

// kernel: basic_block_forward.6
= control target key start
LH: loop header
LB: loop body
LE: loop exit
PB: predicated region body
PF: predicated region fallthrough
CT: control target
= control target key end

     0   :  { %s676_s15 = smov 0   ;;  %s738_s0 = inlined_call_operand.vmem [shape: bf16[128,128], index: 0, kind: input, shape index: {}]   ;;  %s739_s1 = inlined_call_operand.vmem [shape: bf16[128,128], index: 1, kind: input, shape index: {}]   ;;  %s740_s2 = inlined_call_operand.vmem [shape: f32[128,128], index: 2, kind: output, shape index: {0}]   ;;  %s741_s3 = inlined_call_operand.vmem [shape: f32[16,128], index: 3, kind: output, shape index: {1}]   ;;  %s742_s4 = inlined_call_operand.vmem [shape: f32[16,128], index: 4, kind: output, shape index: {2}]  }
   0x1 LB: > { %s682_s16 = sadd.s32 4294967295, %s649_s15   ;;  %p550_p0 = scmp.ge.s32.totalorder %s649_s15, 1  ;;  %s649_s15 = sphi %s676_s15, %s15_s15  }
   0x2   : > { %p168_p1 = scmp.lt.s32.totalorder %s649_s15, 3 }
   0x4   : > { %p169_p2 = pnand %p550_p0, %p168_p1 }
   0x5   : > { %s551_s19 = sshll.u32 (!%p169_p2), %s682_s16, 3  ;;  %p214_p4 = scmp.lt.s32.totalorder (!%p169_p2), %s682_s16, 1 }
   0x6   : > { %172 = sbr.rel (%p169_p2) target bundleno = 272 (0x110), region = 28  ;;  %p203_p3 = scmp.lt.s32.totalorder (!%p169_p2), %s551_s19, 15 }
   0xb   : > { %v631_v0 = vld [vmem:[%s739_s1 + $0x38] sm:$0xff]   ;;  %v632_v1 = vld [vmem:[%s739_s1 + $0x30] sm:$0xff]   ;;  %s744_s19 = smov (!%p203_p3, %s551_s19), 15  ;;  %v633_v2 = vld [vmem:[%s739_s1 + $0x28] sm:$0xff]   ;;  %s746_s16 = smov (!%p214_p4, %s682_s16), 1 }
   0xc   : > { %583 = vmatprep.subr.bf16.mxu0 %v631_v0  ;;  %607 = vmatprep.subr.bf16.mxu1 %v631_v0  ;;  %s552_s24 = sshll.u32 %s744_s19, 2  ;;  %v634_v3 = vld [vmem:[%s739_s1 + $0x20] sm:$0xff]   ;;  %v635_v6 = vld [vmem:[%s739_s1 + $0x18] sm:$0xff]   ;;  %v636_v7 = vld [vmem:[%s739_s1 + $0x10] sm:$0xff]   ;;  %s554_s12 = sshll.u32 %s744_s19, 3 }
   0xd   : > { %584 = vmatpush3.bf16.msra.mxu0 %v631_v0  ;;  %615 = vmatpush3.bf16.msra.mxu1 %v631_v0  ;;  %s702_s27 = scalar_lea.vmem %s738_s0, %s552_s24  ;;  %v637_v8 = vld [vmem:[%s739_s1 + $0x8] sm:$0xff]   ;;  %v638_v9 = vld [vmem:[%s739_s1] sm:$0xff]   ;;  %s212_s17 = scalar_lea.vmem %s740_s2, %s554_s12 }
   0xe   : > { %585 = vmatprep.subr.bf16.mxu0 %v632_v1  ;;  %608 = vmatprep.subr.bf16.mxu1 %v632_v1  ;;  %v639_v4 = vld [vmem:[%s702_s27] sm:$0xff]   ;;  %v641_v5 = vld [vmem:[%s702_s27 + $0x10] sm:$0xff]   ;;  %v640_v10 = vld [vmem:[%s702_s27 + $0x8] sm:$0xff]   ;;  %s555_s18 = sshll.u32 %s746_s16, 3 }
   0xf   : > { %599 = vmatprep.mubr.bf16.mxu0 %v639_v4  ;;  %603 = vmatprep.mubr.bf16.mxu1 %v641_v5  ;;  %v642_v11 = vld [vmem:[%s702_s27 + $0x18] sm:$0xff]   ;;  %s217_s21 = scalar_lea.vmem %s741_s3, %s555_s18  ;;  %s221_s24 = scalar_lea.vmem %s742_s4, %s555_s18 }
  0x11   : > { %586 = vmatpush3.bf16.msra.mxu0 %v632_v1  ;;  %616 = vmatpush3.bf16.msra.mxu1 %v632_v1 }
  0x12   : > { %587 = vmatprep.subr.bf16.mxu0 %v633_v2  ;;  %609 = vmatprep.subr.bf16.mxu1 %v633_v2 }
  0x15   : > { %588 = vmatpush3.bf16.msra.mxu0 %v633_v2  ;;  %617 = vmatpush3.bf16.msra.mxu1 %v633_v2 }
  0x16   : > { %589 = vmatprep.subr.bf16.mxu0 %v634_v3  ;;  %610 = vmatprep.subr.bf16.mxu1 %v634_v3 }
  0x19   : > { %590 = vmatpush3.bf16.msra.mxu0 %v634_v3  ;;  %618 = vmatpush3.bf16.msra.mxu1 %v634_v3 }
  0x1a   : > { %591 = vmatprep.subr.bf16.mxu0 %v635_v6  ;;  %611 = vmatprep.subr.bf16.mxu1 %v635_v6 }
  0x1d   : > { %592 = vmatpush3.bf16.msra.mxu0 %v635_v6  ;;  %619 = vmatpush3.bf16.msra.mxu1 %v635_v6 }
  0x1e   : > { %593 = vmatprep.subr.bf16.mxu0 %v636_v7  ;;  %612 = vmatprep.subr.bf16.mxu1 %v636_v7 }
  0x21   : > { %594 = vmatpush3.bf16.msra.mxu0 %v636_v7  ;;  %620 = vmatpush3.bf16.msra.mxu1 %v636_v7 }
  0x22   : > { %595 = vmatprep.subr.bf16.mxu0 %v637_v8  ;;  %613 = vmatprep.subr.bf16.mxu1 %v637_v8 }
  0x25   : > { %596 = vmatpush3.bf16.msra.mxu0 %v637_v8  ;;  %621 = vmatpush3.bf16.msra.mxu1 %v637_v8 }
  0x26   : > { %597 = vmatprep.subr.bf16.mxu0 %v638_v9  ;;  %614 = vmatprep.subr.bf16.mxu1 %v638_v9 }
  0x29   : > { %598 = vmatpush3.bf16.msra.mxu0 %v638_v9  ;;  %622 = vmatpush3.bf16.msra.mxu1 %v638_v9 }
  0x2c   : > { %600 = vmatmul.mubr.bf16.vlgmr.msra.gmra.mxu0 %v640_v10  ;;  %604 = vmatmul.mubr.bf16.vlgmr.msra.gmra.mxu1 %v642_v11 }
  0xec   : > { %v601_v12 = vpop.f32.mrf.mxu0  ;;  %v605_v13 = vpop.f32.mrf.mxu1 }
  0xed   : > { %386 = vst [vmem:[%s212_s17 + $0x10] sm:$0xff] %v601_v12  ;;  %390 = vst [vmem:[%s212_s17 + $0x30] sm:$0xff] %v605_v13  ;;  %v407_v23 = vmul.f32 %v601_v12, %v601_v12  ;;  %v411_v35 = vmul.f32 %v605_v13, %v605_v13 }
  0xee   : > { %v353_v14 = vpop.f32.mrf.mxu0  ;;  %v369_v15 = vpop.f32.mrf.mxu1 }
  0xef   : > { %384 = vst [vmem:[%s212_s17] sm:$0xff] %v353_v14  ;;  %388 = vst [vmem:[%s212_s17 + $0x20] sm:$0xff] %v369_v15  ;;  %v405_v20 = vmul.f32 %v353_v14, %v353_v14  ;;  %v409_v29 = vmul.f32 %v369_v15, %v369_v15 }
  0xf0   : > { %v602_v16 = vpop.f32.mrf.mxu0  ;;  %v606_v17 = vpop.f32.mrf.mxu1 }
  0xf1   : > { %387 = vst [vmem:[%s212_s17 + $0x18] sm:$0xff] %v602_v16  ;;  %391 = vst [vmem:[%s212_s17 + $0x38] sm:$0xff] %v606_v17  ;;  %v408_v26 = vmul.f32 %v602_v16, %v602_v16  ;;  %v412_v38 = vmul.f32 %v606_v17, %v606_v17 }
  0xf2   : > { %v356_v18 = vpop.f32.mrf.mxu0  ;;  %v372_v19 = vpop.f32.mrf.mxu1 }
  0xf3   : > { %385 = vst [vmem:[%s212_s17 + $0x8] sm:$0xff] %v356_v18  ;;  %v392_v21 = vadd.f32 %v356_v18, %v353_v14  ;;  %v406_v22 = vmul.f32 %v356_v18, %v356_v18  ;;  %389 = vst [vmem:[%s212_s17 + $0x28] sm:$0xff] %v372_v19  ;;  %v410_v33 = vmul.f32 %v372_v19, %v372_v19 }
  0xf5   : > { %v393_v24 = vadd.f32 %v601_v12, %v392_v21  ;;  %v413_v25 = vadd.f32 %v406_v22, %v405_v20 }
  0xf7   : > { %v414_v27 = vadd.f32 %v413_v25, %v407_v23  ;;  %v394_v28 = vadd.f32 %v602_v16, %v393_v24 }
  0xf9   : > { %v395_v30 = vadd.f32 %v394_v28, %v369_v15  ;;  %v415_v31 = vadd.f32 %v414_v27, %v408_v26 }
  0xfb   : > { %v396_v32 = vadd.f32 %v395_v30, %v372_v19  ;;  %v416_v34 = vadd.f32 %v415_v31, %v409_v29 }
  0xfd   : > { %v397_v36 = vadd.f32 %v605_v13, %v396_v32  ;;  %v417_v37 = vadd.f32 %v416_v34, %v410_v33 }
  0xff   : > { %v398_v39 = vadd.f32 %v606_v17, %v397_v36  ;;  %v418_v40 = vadd.f32 %v417_v37, %v411_v35 }
 0x101   : > { %v399_v41 = vrot.slane %v398_v39, 4  ;;  %v419_v42 = vadd.f32 %v418_v40, %v412_v38 }
 0x103   : > { %v400_v43 = vadd.f32 %v399_v41, %v398_v39  ;;  %v420_v44 = vrot.slane %v419_v42, 4 }
 0x105   : > { %v401_v45 = vrot.slane %v400_v43, 2  ;;  %v421_v46 = vadd.f32 %v420_v44, %v419_v42 }
 0x107   : > { %v402_v47 = vadd.f32 %v401_v45, %v400_v43  ;;  %v422_v48 = vrot.slane %v421_v46, 2 }
 0x109   : > { %v403_v49 = vrot.slane %v402_v47, 1  ;;  %v423_v50 = vadd.f32 %v422_v48, %v421_v46 }
 0x10b   : > { %v404_v51 = vadd.f32 %v403_v49, %v402_v47  ;;  %v424_v52 = vrot.slane %v423_v50, 1 }
 0x10d   : > { %v425_v53 = vadd.f32 %v424_v52, %v423_v50  ;;  %426 = vst [vmem:[%s217_s21] sm:$0xff] %v404_v51 }
 0x10f   : > { %427 = vst [vmem:[%s221_s24] sm:$0xff] %v425_v53 }
 0x110 PF: > { %s15_s15 = sadd.s32 1, %s649_s15  }
 0x111   : > { %p12_p5 = scmp.ge.s32.totalorder %s15_s15, 4  }
 0x113   :  { %14 = sbr.rel (!%p12_p5) target bundleno = 1 (0x1), region = 82 }

</bundles_post_ra>
